<compile_context>
chip_gen: v7x
topology: tpu7x:2x2x1
jax: 0.10.0
libtpu: 0.0.40
codegen_flags: <defaults>
</compile_context>

<pallas_src>
import functools

import jax
import jax.numpy as jnp
from jax import lax
from jax.experimental import pallas as pl
from jax.experimental.pallas import tpu as pltpu


def focal_loss_kernel(logits_ref, targets_ref, out_ref, *, n_rows, tm, chunk):
    p = pl.program_id(0)          # parallel partition (megacore split)
    k = pl.program_id(1)          # row-block within the partition (reduction axis)
    nk = pl.num_programs(1)

    # Output block is resident across the k axis -> use it directly as accumulator.
    @pl.when(k == 0)
    def _init():
        out_ref[...] = jnp.zeros_like(out_ref)

    cp = logits_ref.shape[1]
    base_row = (p * nk + k) * tm

    # Hoisted (loop-invariant) iotas: JAX does not CSE broadcast_in_dim.
    col = lax.broadcasted_iota(jnp.int32, (chunk, cp), 1)
    row_iota = lax.broadcasted_iota(jnp.int32, (chunk, 1), 0)

    def body(c, carry):
        r0 = pl.multiple_of(c * chunk, 8)                               # sublane aligned
        lg = logits_ref[pl.ds(r0, chunk), :].astype(jnp.float32)        # (chunk, cp)
        tg = targets_ref[pl.ds(r0, chunk), :]                           # (chunk, 1) int32
        valid = (base_row + r0 + row_iota) < n_rows                     # (chunk, 1)

        # Numerically stable logsumexp along the lane (class) axis.
        m = jnp.max(lg, axis=-1, keepdims=True)                         # XLU reduce / row
        se = jnp.sum(jnp.exp(lg - m), axis=-1, keepdims=True)           # XLU reduce / row
        lse = m + jnp.log(se)                                           # (chunk, 1)

        # Target-logit: elementwise select + ONE full-tile reduce (no per-row gather-reduce).
        tgt_sum = jnp.sum(jnp.where((col == tg) & valid, lg, 0.0))
        ce_sum = jnp.sum(jnp.where(valid, lse, 0.0))
        out_ref[...] += (ce_sum - tgt_sum)                              # scalar broadcast add
        return carry

    lax.fori_loop(0, tm // chunk, body, 0, unroll=(tm // chunk) <= 8)


def _vmem_capacity_bytes():
    """Per-core physical VMEM; conservative (v7x-sized) fallback if the query fails."""
    try:
        cap = getattr(pltpu.get_tpu_info(), "vmem_capacity_bytes", None)
        if cap:
            return int(cap)
    except Exception:
        pass
    return 64 << 20


def focal_loss(outputs, targets, alpha=1.0, gamma=2.0, tm_override=None):
    """outputs: [N, C] float logits; targets: [N] int class ids -> scalar f32 focal loss."""
    n, c = outputs.shape
    dtype = outputs.dtype
    itemsize = jnp.dtype(dtype).itemsize

    # Lane-dense class axis: pad C to a multiple of 128 so padded classes never win
    # the max nor contribute to sum(exp); finfo.min is safe for f16/bf16 too.
    cp = ((c + 127) // 128) * 128
    if cp != c:
        neg = jnp.finfo(dtype).min if jnp.issubdtype(dtype, jnp.floating) else -1e30
        outputs = jnp.pad(outputs, ((0, 0), (0, cp - c)), constant_values=neg)

    # Generation-aware VMEM budget (v5e/v6e phys 128 MiB -> 64 MiB scoped request;
    # v7x phys 64 MiB -> 32 MiB).  Never assume v6e-style headroom on v7x.
    vmem_phys = _vmem_capacity_bytes()
    vmem_limit = min(vmem_phys // 2, 64 << 20)

    # Inner row sub-chunk: bounds each in-kernel f32 temporary to ~1 MiB.
    chunk = max(8, min(512, ((1 << 20) // max(1, cp * 4)) // 8 * 8))

    # Per-row VMEM cost of one input-buffer pair: logits row + lane-padded int32
    # targets row ((tm,1) int32 occupies tm/8 vregs = 512 B/row in VMEM).
    bytes_per_row = cp * itemsize + 512
    if tm_override is None:
        pair_budget = vmem_limit // 6          # x2 double-buffering -> 1/3 of the limit
        tm = max(8, (pair_budget // bytes_per_row) // 8 * 8)
    else:
        tm = max(8, (int(tm_override) // 8) * 8)
    tm = min(tm, ((n + 7) // 8) * 8)           # don't exceed what's needed to cover N
    chunk = min(chunk, tm)
    tm = max(chunk, (tm // chunk) * chunk)     # tm must be a multiple of chunk

    # Grid: ("parallel", "arbitrary"); parallel axis feeds both TensorCores on v7x,
    # is a harmless size-2 outer loop on single-TC v5e/v6e.
    n_blocks = pl.cdiv(n, tm)
    n_par = 2 if n_blocks >= 2 else 1
    n_k = pl.cdiv(n_blocks, n_par)
    n_pad = n_par * n_k * tm

    targets = targets.astype(jnp.int32)
    if n_pad != n:
        outputs = jnp.pad(outputs, ((0, n_pad - n), (0, 0)))
        targets = jnp.pad(targets, (0, n_pad - n))
    targets2d = targets.reshape(n_pad, 1)

    # Best-effort: if the floor-sized pipeline (huge C) exceeds the requested scoped
    # limit, raise it toward physical instead of silently compile-failing.
    est = 2 * tm * bytes_per_row + 6 * chunk * cp * 4 + (2 << 20)
    if est > vmem_limit:
        vmem_limit = max(vmem_limit, min(est, vmem_phys - (4 << 20)))

    kernel = functools.partial(focal_loss_kernel, n_rows=n, tm=tm, chunk=chunk)
    partials = pl.pallas_call(
        kernel,
        out_shape=jax.ShapeDtypeStruct((n_par, 8, 128), jnp.float32),
        grid_spec=pltpu.PrefetchScalarGridSpec(
            num_scalar_prefetch=0,
            grid=(n_par, n_k),
            in_specs=[
                pl.BlockSpec((tm, cp), lambda p, k: (p * n_k + k, 0)),
                pl.BlockSpec((tm, 1), lambda p, k: (p * n_k + k, 0)),
            ],
            out_specs=pl.BlockSpec((1, 8, 128), lambda p, k: (p, 0, 0)),
        ),
        compiler_params=pltpu.CompilerParams(
            dimension_semantics=("parallel", "arbitrary"),
            vmem_limit_bytes=int(vmem_limit),
        ),
    )(outputs, targets2d)

    # Tiny scalar epilogue in the wrapper: mean CE over the batch, then focal modulation
    # (matches nn.CrossEntropyLoss mean reduction followed by alpha*(1-pt)^gamma*ce).
    total_ce = jnp.sum(partials[:, 0, 0])
    mean_ce = total_ce / jnp.float32(n)
    pt = jnp.exp(-mean_ce)
    return jnp.float32(alpha) * (1.0 - pt) ** jnp.float32(gamma) * mean_ce


def focal_loss_ref(outputs, targets, alpha=1.0, gamma=2.0):
    # Pure-JAX reference matching the PyTorch module (mean CE, then modulation).
    logits = outputs.astype(jnp.float32)
    logp = jax.nn.log_softmax(logits, axis=-1)
    ce = -jnp.mean(jnp.take_along_axis(logp, targets[:, None].astype(jnp.int32), axis=-1))
    pt = jnp.exp(-ce)
    return alpha * (1.0 - pt) ** gamma * ce


if __name__ == "__main__":
    key = jax.random.PRNGKey(0)
    k1, k2, k3, k4 = jax.random.split(key, 4)

    # Case 1: small MLP-classifier shapes, single-block path.
    n1, c1 = 64, 10
    x1 = jax.random.normal(k1, (n1, c1), dtype=jnp.float32)
    t1 = jax.random.randint(k2, (n1,), 0, c1, dtype=jnp.int32)
    loss1 = focal_loss(x1, t1, alpha=1.0, gamma=2.0)
    jax.block_until_ready(loss1)
    ref1 = focal_loss_ref(x1, t1, alpha=1.0, gamma=2.0)
    assert jnp.allclose(loss1, ref1, rtol=1e-5, atol=1e-5), (loss1, ref1)

    # Case 2: exercises row masking (N not multiple of tm), class padding (odd C),
    # multi-block reduction and the 2-way parallel partition.
    n2, c2 = 300, 37
    x2 = jax.random.normal(k3, (n2, c2), dtype=jnp.float32)
    t2 = jax.random.randint(k4, (n2,), 0, c2, dtype=jnp.int32)
    loss2 = focal_loss(x2, t2, alpha=0.5, gamma=2.0, tm_override=64)
    jax.block_until_ready(loss2)
    ref2 = focal_loss_ref(x2, t2, alpha=0.5, gamma=2.0)
    assert jnp.allclose(loss2, ref2, rtol=1e-5, atol=1e-5), (loss2, ref2)

    print("KERNEL_OK")
</pallas_src>

<mosaic_0001>
module attributes {stable_mosaic.version = 11 : i64} {
  func.func @focal_loss_kernel(%arg0: i32, %arg1: i32, %arg2: memref<64x128xf32, #tpu.memory_space<vmem>>, %arg3: memref<64x1xi32, #tpu.memory_space<vmem>>, %arg4: memref<1x8x128xf32, #tpu.memory_space<vmem>>) attributes {dimension_semantics = [#tpu.dimension_semantics<parallel>, #tpu.dimension_semantics<arbitrary>], iteration_bounds = array<i64: 1, 1>, scalar_prefetch = 0 : i64, scratch_operands = 0 : i64, tpu.core_type = #tpu.core_type<tc>, window_params = [{transform_indices = @transform_0, window_bounds = array<i64: 64, 128>}, {transform_indices = @transform_1, window_bounds = array<i64: 64, 1>}, {transform_indices = @transform_2, window_bounds = array<i64: 1, 8, 128>}]} {
    %c0_i32 = arith.constant 0 : i32
    %0 = arith.cmpi eq, %arg1, %c0_i32 : i32
    %1 = arith.extui %0 : i1 to i32
    %c0_i32_0 = arith.constant 0 : i32
    %2 = arith.cmpi ne, %1, %c0_i32_0 : i32
    scf.if %2 {
      %cst_17 = arith.constant 0.000000e+00 : f32
      %49 = vector.broadcast %cst_17 : f32 to vector<1x8x128xf32>
      %c0_18 = arith.constant 0 : index
      %c0_19 = arith.constant 0 : index
      %c0_20 = arith.constant 0 : index
      %50 = vector.load %arg4[%c0_18, %c0_19, %c0_20] : memref<1x8x128xf32, #tpu.memory_space<vmem>>, vector<1x8x128xf32>
      tpu.vector_store %arg4[%c0_18, %c0_19, %c0_20], %49 {strides = array<i32>} : memref<1x8x128xf32, #tpu.memory_space<vmem>>, vector<1x8x128xf32>,
    } else {
    }
    %c1_i32 = arith.constant 1 : i32
    %3 = arith.muli %arg0, %c1_i32 : i32
    %4 = arith.addi %3, %arg1 : i32
    %c64_i32 = arith.constant 64 : i32
    %5 = arith.muli %4, %c64_i32 : i32
    %6 = tpu.iota {dimensions = array<i32: 1>} : vector<64x128xi32>
    %7 = tpu.iota {dimensions = array<i32: 0>} : vector<64x1xi32>
    %c0_i32_1 = arith.constant 0 : i32
    %c64_i32_2 = arith.constant 64 : i32
    %8 = arith.muli %c0_i32_1, %c64_i32_2 : i32
    %9 = tpu.assume_multiple %8, 8 : i32
    %10 = arith.index_cast %9 : i32 to index
    %c0 = arith.constant 0 : index
    %11 = vector.load %arg2[%10, %c0] : memref<64x128xf32, #tpu.memory_space<vmem>>, vector<64x128xf32>
    %12 = arith.index_cast %9 : i32 to index
    %c0_3 = arith.constant 0 : index
    %13 = vector.load %arg3[%12, %c0_3] : memref<64x1xi32, #tpu.memory_space<vmem>>, vector<64x1xi32>
    %14 = arith.addi %5, %9 : i32
    %15 = vector.broadcast %14 : i32 to vector<64x1xi32>
    %16 = arith.addi %15, %7 : vector<64x1xi32>
    %c64_i32_4 = arith.constant 64 : i32
    %17 = vector.broadcast %c64_i32_4 : i32 to vector<64x1xi32>
    %18 = arith.cmpi slt, %16, %17 : vector<64x1xi32>
    %cst = arith.constant dense<0xFF800000> : vector<64xf32>
    %19 = vector.multi_reduction <maximumf>, %11, %cst [1] : vector<64x128xf32> to vector<64xf32>
    %20 = vector.shape_cast %19 : vector<64xf32> to vector<64x1xf32>
    %21 = vector.broadcast %20 : vector<64x1xf32> to vector<64x128xf32>
    %22 = arith.subf %11, %21 : vector<64x128xf32>
    %23 = math.exp %22 : vector<64x128xf32>
    %cst_5 = arith.constant dense<0.000000e+00> : vector<64xf32>
    %24 = vector.multi_reduction <add>, %23, %cst_5 [1] : vector<64x128xf32> to vector<64xf32>
    %25 = vector.shape_cast %24 : vector<64xf32> to vector<64x1xf32>
    %26 = math.log %25 : vector<64x1xf32>
    %27 = arith.addf %20, %26 : vector<64x1xf32>
    %28 = vector.broadcast %13 : vector<64x1xi32> to vector<64x128xi32>
    %29 = arith.cmpi eq, %6, %28 : vector<64x128xi32>
    %30 = vector.broadcast %18 : vector<64x1xi1> to vector<64x128xi1>
    %31 = arith.andi %29, %30 : vector<64x128xi1>
    %cst_6 = arith.constant 0.000000e+00 : f32
    %32 = vector.broadcast %cst_6 : f32 to vector<64x128xf32>
    %33 = arith.select %31, %11, %32 : vector<64x128xi1>, vector<64x128xf32>
    %34 = vector.shape_cast %33 : vector<64x128xf32> to vector<1x64x128xf32>
    %cst_7 = arith.constant dense<0.000000e+00> : vector<1xf32>
    %35 = vector.multi_reduction <add>, %34, %cst_7 [1, 2] : vector<1x64x128xf32> to vector<1xf32>
    %36 = vector.shape_cast %35 : vector<1xf32> to vector<1x1x1xf32>
    %37 = vector.extract %36[0, 0, 0] : f32 from vector<1x1x1xf32>
    %cst_8 = arith.constant 0.000000e+00 : f32
    %38 = vector.broadcast %cst_8 : f32 to vector<64x1xf32>
    %39 = arith.select %18, %27, %38 : vector<64x1xi1>, vector<64x1xf32>
    %40 = vector.shape_cast %39 : vector<64x1xf32> to vector<1x64x1xf32>
    %cst_9 = arith.constant dense<0.000000e+00> : vector<1xf32>
    %41 = vector.multi_reduction <add>, %40, %cst_9 [1, 2] : vector<1x64x1xf32> to vector<1xf32>
    %42 = vector.shape_cast %41 : vector<1xf32> to vector<1x1x1xf32>
    %43 = vector.extract %42[0, 0, 0] : f32 from vector<1x1x1xf32>
    %c0_10 = arith.constant 0 : index
    %c0_11 = arith.constant 0 : index
    %c0_12 = arith.constant 0 : index
    %44 = vector.load %arg4[%c0_10, %c0_11, %c0_12] : memref<1x8x128xf32, #tpu.memory_space<vmem>>, vector<1x8x128xf32>
    %45 = arith.subf %43, %37 : f32
    %46 = vector.broadcast %45 : f32 to vector<1x8x128xf32>
    %47 = arith.addf %44, %46 : vector<1x8x128xf32>
    %c0_13 = arith.constant 0 : index
    %c0_14 = arith.constant 0 : index
    %c0_15 = arith.constant 0 : index
    %48 = vector.load %arg4[%c0_13, %c0_14, %c0_15] : memref<1x8x128xf32, #tpu.memory_space<vmem>>, vector<1x8x128xf32>
    tpu.vector_store %arg4[%c0_13, %c0_14, %c0_15], %47 {strides = array<i32>} : memref<1x8x128xf32, #tpu.memory_space<vmem>>, vector<1x8x128xf32>,
    %c1_i32_16 = arith.constant 1 : i32
    return
  }
  func.func @transform_0(%arg0: i32, %arg1: i32) -> (i32, i32) {
    %c1_i32 = arith.constant 1 : i32
    %0 = arith.muli %arg0, %c1_i32 : i32
    %1 = arith.addi %0, %arg1 : i32
    %c0_i32 = arith.constant 0 : i32
    %c0_i32_0 = arith.constant 0 : i32
    return %1, %c0_i32 : i32, i32
  }
  func.func @transform_1(%arg0: i32, %arg1: i32) -> (i32, i32) {
    %c1_i32 = arith.constant 1 : i32
    %0 = arith.muli %arg0, %c1_i32 : i32
    %1 = arith.addi %0, %arg1 : i32
    %c0_i32 = arith.constant 0 : i32
    %c0_i32_0 = arith.constant 0 : i32
    return %1, %c0_i32 : i32, i32
  }
  func.func @transform_2(%arg0: i32, %arg1: i32) -> (i32, i32, i32) {
    %c0_i32 = arith.constant 0 : i32
    %c0_i32_0 = arith.constant 0 : i32
    %c0_i32_1 = arith.constant 0 : i32
    return %arg0, %c0_i32, %c0_i32_0 : i32, i32, i32
  }
}

</mosaic_0001>

<bundles_post_ra>
// kernel: tpu_custom_call.1
= control target key start
LH: loop header
LB: loop body
LE: loop exit
PB: predicated region body
PF: predicated region fallthrough
CT: control target
= control target key end

     0   :  { %s554_s0 = inlined_call_operand.vmem [shape: f32[64,128], index: 0, kind: input, shape index: {}]   ;;  %s555_s1 = inlined_call_operand.vmem [shape: s32[64,1], index: 1, kind: input, shape index: {}]   ;;  %s556_s2 = inlined_call_operand.hbm [shape: f32[1,8,128], index: 2, kind: output, shape index: {}]  }
   0x1   :  { %v417_v0 = vld [vmem:[%s554_s0] sm:$0xff]  ;;  %v422_v1 = vld [vmem:[%s554_s0 + $0x10] sm:$0xff]  ;;  %v429_v2 = vld [vmem:[%s554_s0 + $0x8] sm:$0xff] }
   0x2   :  { %108 = vmax.xlane.f32.xlu0 %v417_v0  ;;  %112 = vmax.xlane.f32.xlu1 %v422_v1  ;;  %v434_v3 = vld [vmem:[%s554_s0 + $0x18] sm:$0xff] }
   0x3   :  { %7 = vsyncpa [#allocation3], 0  ;;  %v441_v4 = vld [vmem:[%s554_s0 + $0x20] sm:$0xff]  ;;  %v446_v5 = vld [vmem:[%s554_s0 + $0x28] sm:$0xff]  ;;  %v397_v8 = vmov 0   ;;  %v63_v59 = vlaneseq  ;;  %vm276_vm2 = vcmask 7168  }
   0x4   :  { %v453_v6 = vld [vmem:[%s554_s0 + $0x30] sm:$0xff]  ;;  %v458_v7 = vld [vmem:[%s554_s0 + $0x38] sm:$0xff]  ;;  %340 = vset.pattern.permute.xlu1 %v397_v8  ;;  %339 = vset.pattern.permute.xlu0 %v397_v8  ;;  %v83_v37 = vld [vmem:[%s555_s1 + $0x8] sm:$0xff]  ;;  %s398_s14 = smov [#allocation2]  }
   0x5   :  { %v84_v38 = vld [vmem:[%s555_s1 + $0x10] sm:$0xff]  ;;  %v82_v39 = vld [vmem:[%s555_s1] sm:$0xff]  ;;  %v85_v40 = vld [vmem:[%s555_s1 + $0x18] sm:$0xff]  ;;  %v64_v63 = vand.u32 127, %v63_v59  ;;  %s312_s15 = sshll.u32 %s398_s14, 4  ;;  %s313_s15 = int_to_ptr.vmem [resolvable:$true] %s312_s15 }
   0x6   :  { %110 = vmax.xlane.f32.xlu0 %v429_v2  ;;  %114 = vmax.xlane.f32.xlu1 %v434_v3  ;;  %v86_v41 = vld [vmem:[%s555_s1 + $0x20] sm:$0xff]  ;;  %v87_v42 = vld [vmem:[%s555_s1 + $0x28] sm:$0xff]  ;;  %v88_v43 = vld [vmem:[%s555_s1 + $0x30] sm:$0xff]  ;;  %s373_s16 = scalar_lea.vmem %s313_s15, 128  ;;  %p378_p1 = scmp.lt.s32.totalorder %s313_s15, %s313_s15 }
   0x7   :  { %v89_v48 = vld [vmem:[%s555_s1 + $0x38] sm:$0xff]  ;;  %p374_p0 = scmp.ne.s32.totalorder %s313_s15, %s373_s16  ;;  %p379_p2 = scmp.lt.s32.totalorder %s373_s16, %s373_s16 }
   0x9   :  { %p380_p3 = por %p379_p2, %p378_p1 }
   0xa   :  { %116 = vmax.xlane.f32.xlu0 %v441_v4  ;;  %118 = vmax.xlane.f32.xlu1 %v446_v5 }
   0xb   :  { %p381_p4 = pnand %p380_p3, %p374_p0 }
   0xe   :  { %120 = vmax.xlane.f32.xlu0 %v453_v6  ;;  %122 = vmax.xlane.f32.xlu1 %v458_v7 }
  0x8f   :  { %v462_v9 = vpop.xlane.xlu0 %108  ;;  %v464_v10 = vpop.xlane.xlu1 %112 }
  0x90   :  { %v124_v11 = vsub.f32 %v417_v0, %v462_v9  ;;  %v126_v12 = vsub.f32 %v422_v1, %v464_v10 }
  0x92   :  { %v132_v13 = vmul.f32 1.442695, %v124_v11  ;;  %v136_v14 = vmul.f32 1.442695, %v126_v12 }
  0x93   :  { %v470_v15 = vpop.xlane.xlu0 %110  ;;  %v472_v16 = vpop.xlane.xlu1 %114 }
  0x94   :  { %341 = vpow2.f32 %v132_v13  ;;  %v125_v17 = vsub.f32 %v429_v2, %v470_v15  ;;  %v127_v18 = vsub.f32 %v434_v3, %v472_v16 }
  0x95   :  { %343 = vpow2.f32 %v136_v14 }
  0x96   :  { %v134_v19 = vmul.f32 1.442695, %v125_v17  ;;  %v138_v20 = vmul.f32 1.442695, %v127_v18 }
  0x97   :  { %v478_v21 = vpop.xlane.xlu0 %116  ;;  %v480_v22 = vpop.xlane.xlu1 %118 }
  0x98   :  { %345 = vpow2.f32 %v134_v19  ;;  %v128_v23 = vsub.f32 %v441_v4, %v478_v21  ;;  %v129_v24 = vsub.f32 %v446_v5, %v480_v22 }
  0x99   :  { %347 = vpow2.f32 %v138_v20 }
  0x9a   :  { %v140_v25 = vmul.f32 1.442695, %v128_v23  ;;  %v142_v26 = vmul.f32 1.442695, %v129_v24 }
  0x9b   :  { %v486_v27 = vpop.xlane.xlu0 %120  ;;  %v511_v44 = vpop.xlane.xlu1 %122 }
  0x9c   :  { %349 = vpow2.f32 %v140_v25  ;;  %v130_v28 = vsub.f32 %v453_v6, %v486_v27  ;;  %v131_v45 = vsub.f32 %v458_v7, %v511_v44 }
  0x9d   :  { %351 = vpow2.f32 %v142_v26 }
  0x9e   :  { %v342_v29 = vpop.eup %341  ;;  %v144_v30 = vmul.f32 1.442695, %v130_v28  ;;  %v146_v46 = vmul.f32 1.442695, %v131_v45 }
  0x9f   :  { %148 = vadd.xlane.f32.xlu0 %v342_v29  ;;  %v344_v31 = vpop.eup %343 }
  0xa0   :  { %353 = vpow2.f32 %v144_v30 }
  0xa1   :  { %355 = vpow2.f32 %v146_v46 }
  0xa2   :  { %v346_v32 = vpop.eup %345 }
  0xa3   :  { %152 = vadd.xlane.f32.xlu0 %v344_v31  ;;  %150 = vadd.xlane.f32.xlu1 %v346_v32  ;;  %v348_v33 = vpop.eup %347 }
  0xa6   :  { %v350_v34 = vpop.eup %349 }
  0xa7   :  { %154 = vadd.xlane.f32.xlu1 %v348_v33  ;;  %156 = vadd.xlane.f32.xlu0 %v350_v34  ;;  %v352_v35 = vpop.eup %351 }
  0xaa   :  { %v354_v36 = vpop.eup %353 }
  0xab   :  { %158 = vadd.xlane.f32.xlu1 %v352_v35  ;;  %160 = vadd.xlane.f32.xlu0 %v354_v36  ;;  %v356_v47 = vpop.eup %355 }
  0xbc   :  { %192 = vperm.xlu1 %340, %v83_v37  }
  0xc0   :  { %195 = vperm.xlu1 %340, %v84_v38  }
  0xc1   :  { %189 = vperm.xlu0 %339, %v82_v39  }
  0xc4   :  { %198 = vperm.xlu1 %340, %v85_v40  }
  0xc8   :  { %201 = vperm.xlu1 %340, %v86_v41  }
  0xcc   :  { %204 = vperm.xlu1 %340, %v87_v42  }
  0xd0   :  { %207 = vperm.xlu1 %340, %v88_v43  }
  0xf4   :  { %162 = vadd.xlane.f32.xlu1 %v356_v47 }
 0x105   :  { %210 = vperm.xlu1 %340, %v89_v48  }
 0x12c   :  { %v149_v51 = vpop.xlane.xlu0 %148 }
 0x130   :  { %v151_v49 = vpop.xlane.xlu1 %150  ;;  %v153_v53 = vpop.xlane.xlu0 %152 }
 0x131   :  { %357 = vlog2.f32 %v151_v49 }
 0x132   :  { %359 = vlog2.f32 %v149_v51 }
 0x133   :  { %361 = vlog2.f32 %v153_v53 }
 0x134   :  { %v155_v50 = vpop.xlane.xlu1 %154  ;;  %v157_v55 = vpop.xlane.xlu0 %156 }
 0x135   :  { %363 = vlog2.f32 %v155_v50 }
 0x136   :  { %365 = vlog2.f32 %v157_v55 }
 0x138   :  { %v159_v52 = vpop.xlane.xlu1 %158  ;;  %v161_v57 = vpop.xlane.xlu0 %160 }
 0x139   :  { %367 = vlog2.f32 %v159_v52 }
 0x13a   :  { %369 = vlog2.f32 %v161_v57 }
 0x13b   :  { %v358_v60 = vpop.eup %357 }
 0x13c   :  { %v193_v54 = vpop.permute.xlu1 %192  ;;  %v360_v62 = vpop.eup %359  ;;  %v167_v8 = vmul.f32 0.6931472, %v358_v60 }
 0x13d   :  { %v165_v12 = vmul.f32 0.6931472, %v360_v62  ;;  %v362_v13 = vpop.eup %361  ;;  %vm213_vm1 = vcmp.eq.s32.totalorder %v64_v63, %v193_v54 }
 0x13e   :  { %v181_v14 = vadd.f32 %v167_v8, %v470_v15  ;;  %v169_v20 = vmul.f32 0.6931472, %v362_v13  ;;  %v245_v23 = vsel %vm213_vm1, %v429_v2, 0.0 }
 0x13f   :  { %v364_v18 = vpop.eup %363  ;;  %v180_v19 = vadd.f32 %v165_v12, %v462_v9 }
 0x140   :  { %v196_v56 = vpop.permute.xlu1 %195  ;;  %v190_v61 = vpop.permute.xlu0 %189  ;;  %v278_v26 = vsel %vm276_vm2, %v181_v14, 0.0  ;;  %v171_v28 = vmul.f32 0.6931472, %v364_v18  ;;  %v182_v15 = vadd.f32 %v169_v20, %v464_v10 }
 0x141   :  { %vm212_vm0 = vcmp.eq.s32.totalorder %v64_v63, %v190_v61  ;;  %vm214_vm3 = vcmp.eq.s32.totalorder %v64_v63, %v196_v56  ;;  %v277_v29 = vsel %vm276_vm2, %v180_v19, 0.0  ;;  %v366_v30 = vpop.eup %365 }
 0x142   :  { %v244_v17 = vsel %vm212_vm0, %v417_v0, 0.0  ;;  %v246_v0 = vsel %vm214_vm3, %v422_v1, 0.0  ;;  %v279_v9 = vadd.f32 %v278_v26, %v277_v29  ;;  %v183_v2 = vadd.f32 %v171_v28, %v472_v16 }
 0x143   :  { %v252_v25 = vadd.f32 %v245_v23, %v244_v17  ;;  %v368_v34 = vpop.eup %367  ;;  %v280_v35 = vsel %vm276_vm2, %v182_v15, 0.0  ;;  %v173_v36 = vmul.f32 0.6931472, %v366_v30 }
 0x144   :  { %v199_v58 = vpop.permute.xlu1 %198  ;;  %v281_v38 = vadd.f32 %v280_v35, %v279_v9  ;;  %v282_v1 = vsel %vm276_vm2, %v183_v2, 0.0  ;;  %v175_v39 = vmul.f32 0.6931472, %v368_v34  ;;  %v370_v43 = vpop.eup %369 }
 0x145   :  { %vm215_vm4 = vcmp.eq.s32.totalorder %v64_v63, %v199_v58  ;;  %v253_v31 = vadd.f32 %v252_v25, %v246_v0  ;;  %v177_v50 = vmul.f32 0.6931472, %v370_v43 }
 0x146   :  { %v247_v32 = vsel %vm215_vm4, %v434_v3, 0.0  ;;  %v184_v3 = vadd.f32 %v173_v36, %v478_v21  ;;  %v283_v45 = vadd.f32 %v282_v1, %v281_v38 }
 0x147   :  { %v254_v10 = vadd.f32 %v253_v31, %v247_v32 }
 0x148   :  { %v202_v11 = vpop.permute.xlu1 %201  ;;  %v284_v49 = vsel %vm276_vm2, %v184_v3, 0.0 }
 0x149   :  { %vm216_vm5 = vcmp.eq.s32.totalorder %v64_v63, %v202_v11  ;;  %v285_v52 = vadd.f32 %v284_v49, %v283_v45 }
 0x14a   :  { %v248_v37 = vsel %vm216_vm5, %v441_v4, 0.0  ;;  %v185_v4 = vadd.f32 %v175_v39, %v480_v22 }
 0x14b   :  { %v255_v16 = vadd.f32 %v254_v10, %v248_v37 }
 0x14c   :  { %v205_v24 = vpop.permute.xlu1 %204  ;;  %v286_v53 = vsel %vm276_vm2, %v185_v4, 0.0 }
 0x14d   :  { %vm217_vm6 = vcmp.eq.s32.totalorder %v64_v63, %v205_v24  ;;  %v287_v54 = vadd.f32 %v286_v53, %v285_v52 }
 0x14e   :  { %v249_v40 = vsel %vm217_vm6, %v446_v5, 0.0 }
 0x14f   :  { %v256_v46 = vadd.f32 %v255_v16, %v249_v40 }
 0x150   :  { %v208_v33 = vpop.permute.xlu1 %207 }
 0x151   :  { %vm218_vm7 = vcmp.eq.s32.totalorder %v64_v63, %v208_v33 }
 0x152   :  { %v250_v42 = vsel %vm218_vm7, %v453_v6, 0.0  ;;  %v186_v6 = vadd.f32 %v177_v50, %v486_v27 }
 0x153   :  { %v257_v48 = vadd.f32 %v256_v46, %v250_v42 }
 0x154   :  { %v288_v56 = vsel %vm276_vm2, %v186_v6, 0.0 }
 0x155   :  { %v289_v57 = vadd.f32 %v288_v56, %v287_v54 }
 0x181   :  { %v163_v41 = vpop.xlane.xlu1 %162 }
 0x182   :  { %371 = vlog2.f32 %v163_v41 }
 0x185   :  { %v211_v47 = vpop.permute.xlu1 %210 }
 0x186   :  { %vm219_vm8 = vcmp.eq.s32.totalorder %v64_v63, %v211_v47 }
 0x187   :  { %v251_v5 = vsel %vm219_vm8, %v458_v7, 0.0 }
 0x188   :  { %v258_v51 = vadd.f32 %v257_v48, %v251_v5 }
 0x18a   :  { %259 = vadd.xlane.f32.xlu1 %v258_v51 }
 0x18c   :  { %v372_v21 = vpop.eup %371 }
 0x18d   :  { %v179_v55 = vmul.f32 0.6931472, %v372_v21 }
 0x18f   :  { %v187_v22 = vadd.f32 %v179_v55, %v511_v44 }
 0x191   :  { %v290_v58 = vsel %vm276_vm2, %v187_v22, 0.0 }
 0x192   :  { %v291_v59 = vadd.f32 %v290_v58, %v289_v57 }
 0x194   :  { %292 = vadd.xlane.f32.xlu0 %v291_v59 }
 0x217   :  { %v260_v7 = vpop.xlane.xlu1 %259 }
 0x218   :  { %v261_v60 = vrot.slane %v260_v7, 4 }
 0x21a   :  { %v262_v61 = vadd.f32 %v261_v60, %v260_v7 }
 0x21c   :  { %v263_v62 = vrot.slane %v262_v61, 2 }
 0x21e   :  { %v264_v63 = vadd.f32 %v263_v62, %v262_v61 }
 0x220   :  { %v265_v8 = vrot.slane %v264_v63, 1 }
 0x221   :  { %v293_v11 = vpop.xlane.xlu0 %292 }
 0x222   :  { %v294_v27 = vrot.slane %v293_v11, 4  ;;  %v266_v12 = vadd.f32 %v265_v8, %v264_v63 }
 0x224   :  { %v295_v13 = vadd.f32 %v294_v27, %v293_v11  ;;  %332 = vpush %v266_v12 }
 0x226   :  { %v296_v14 = vrot.slane %v295_v13, 2 }
 0x228   :  { %v297_v44 = vadd.f32 %v296_v14, %v295_v13 }
 0x22a   :  { %v298_v17 = vrot.slane %v297_v44, 1 }
 0x22c   :  { %v299_v18 = vadd.f32 %v298_v17, %v297_v44 }
 0x22e   :  { %334 = vpush %v299_v18 }
 0x255   :  { %s333_s1 = spop %332 }
 0x25f   :  { %s335_s12 = spop %334 }
 0x260   :  { %s302_s13 = ssub.f32 %s335_s12, %s333_s1 }
 0x262   :  { %v303_v19 = vstv %s302_s13 }
 0x263   :  { %305 = vst [vmem:[#allocation2] sm:$0xff] %v303_v19 }
 0x264   :  { %384 = shalt.err (!%p381_p4)
}
 0x265   :  { %s385_s19 = scalar_lea.hbm %s556_s2, 128 }
 0x266   :  { %p386_p5 = scmp.ne.s32.totalorder %s556_s2, %s385_s19  ;;  %p389_p6 = scmp.lt.u32.totalorder %s385_s19, %s556_s2 }
 0x268   :  { %p391_p7 = pnand %p389_p6, %p386_p5 }
 0x26a   :  { %394 = shalt.err (!%p391_p7)
}
 0x26b   :  { %315 = dma.vmem_to_hbm [thread:$0]  %s313_s15, 128, %s556_s2, [#allocation3]  }
 0x26c   :  { %395 = dma.done.wait [#allocation3], 128  }
 0x26d   :  { %396 = vsyncadd [#allocation3], 4294967168 }
 0x26e   :  { %319 = vsyncpa [#allocation3], 1 }

</bundles_post_ra>
